<compile_context>
chip_gen: v6e
topology: v6e:2x2x1
jax: 0.10.0
libtpu: 0.0.40
codegen_flags: <defaults>
</compile_context>

<pallas_src>
import functools

import jax
import jax.numpy as jnp
from jax import lax
from jax.experimental import pallas as pl
from jax.experimental.pallas import tpu as pltpu


def _round_up(x, m):
    return ((x + m - 1) // m) * m


def _pick_tile(total, cap, align):
    """Largest divisor of `total` that is a multiple of `align` and <= cap.

    `total` is already a multiple of `align`, so `align` is always a valid
    fallback; this bounds ragged-edge padding to the hardware minimum.
    """
    cap = max(align, min(cap, total))
    best = align
    d = align
    while d <= cap:
        if total % d == 0:
            best = d
        d += align
    return best


def _pad2d(a, rows, cols):
    r, c = a.shape
    if r == rows and c == cols:
        return a  # already aligned: skip the extra HBM read+write pass
    return jnp.pad(a, ((0, rows - r), (0, cols - c)))


def _square_linear_small_kernel(x_ref, w_ref, b_ref, o_ref):
    """Whole (padded) problem in one VMEM block: no grid, no scratch, no pl.when."""
    acc = lax.dot_general(
        x_ref[...], w_ref[...],
        dimension_numbers=(((1,), (1,)), ((), ())),   # contract D_in of both
        preferred_element_type=jnp.float32,
    )
    y = acc + b_ref[...]                               # f32 bias add
    o_ref[...] = (y * y).astype(o_ref.dtype)           # f32 square, then cast


def _square_linear_kernel(x_ref, w_ref, b_ref, o_ref, acc_ref):
    """Grid = (M//tm, N//tn, K//tk); K (axis 2) is the reduction axis."""
    k = pl.program_id(2)

    @pl.when(k == 0)
    def _():
        acc_ref[...] = jnp.zeros_like(acc_ref)

    # x tile: (tm, tk) bf16, w tile: (tn, tk) bf16 -> bf16 MXU, f32 accumulate.
    acc_ref[...] += lax.dot_general(
        x_ref[...], w_ref[...],
        dimension_numbers=(((1,), (1,)), ((), ())),
        preferred_element_type=jnp.float32,
    )

    @pl.when(k == pl.num_programs(2) - 1)
    def _():
        # Epilogue (VPU): bias add + square in f32, then cast to output dtype.
        y = acc_ref[...] + b_ref[...]                  # (tm, tn) + (1, tn)
        o_ref[...] = (y * y).astype(o_ref.dtype)


@functools.partial(
    jax.jit,
    static_argnames=("tm", "tn", "tk", "compute_dtype", "fast_path_max_bytes"),
)
def square_layer(x, weight, bias, *, tm=512, tn=512, tk=1024,
                 compute_dtype=jnp.bfloat16, fast_path_max_bytes=8 << 20):
    """x: (B, D_in), weight: (D_out, D_in) (PyTorch layout), bias: (D_out,)."""
    B, D_in = x.shape
    D_out = weight.shape[0]
    out_dtype = x.dtype

    compute_dtype = jnp.dtype(compute_dtype)
    in_bytes = compute_dtype.itemsize
    out_bytes = jnp.dtype(out_dtype).itemsize
    sub = 16 if in_bytes == 2 else 8      # bf16 packs two rows per sublane

    # MXU-native dtype for the matmul inputs; accumulation + epilogue stay f32
    # so the square doesn't amplify bf16 rounding error.
    xc = x.astype(compute_dtype)
    wc = weight.astype(compute_dtype)
    bc = bias.astype(jnp.float32)

    # Pad only to the HW alignment minima (sublane / 128-lane), not tile multiples.
    M = _round_up(B, sub)
    K = _round_up(D_in, 128)
    N = _round_up(D_out, 128)

    xp = _pad2d(xc, M, K)                 # zero K-pad: contributes 0 to the acc
    wp = _pad2d(wc, N, K)
    bp = _pad2d(bc.reshape(1, D_out), 1, N)

    # Generation-aware VMEM budget (v7x: 64 MiB physical; v5e/v6e: 128 MiB).
    try:
        vmem_cap = int(pltpu.get_tpu_info().vmem_capacity_bytes)
    except Exception:
        vmem_cap = 64 << 20
    vmem_limit = int(min(100 << 20, max(32 << 20, (vmem_cap * 3) // 4)))

    # --- single-block fast path for small problems ----------------------------
    fast_bytes = (M * K + N * K) * in_bytes + N * 4 + M * N * (out_bytes + 4)
    if fast_bytes <= fast_path_max_bytes:
        out_padded = pl.pallas_call(
            _square_linear_small_kernel,
            out_shape=jax.ShapeDtypeStruct((M, N), out_dtype),
            compiler_params=pltpu.CompilerParams(vmem_limit_bytes=vmem_limit),
        )(xp, wp, bp)
        return out_padded[:B, :D_out]

    # --- tiled (M, N, K) path ---------------------------------------------------
    tm = _pick_tile(M, tm, sub)
    tn = _pick_tile(N, tn, 128)
    tk = _pick_tile(K, tk, 128)

    # v7x has two TensorCores: keep at least 2 parallel (M, N) blocks if possible.
    if (M // tm) * (N // tn) < 2:
        if N >= 2 * 128:
            tn = _pick_tile(N, max(128, tn // 2), 128)
        elif M >= 2 * sub:
            tm = _pick_tile(M, max(sub, tm // 2), sub)

    grid = (M // tm, N // tn, K // tk)

    out_padded = pl.pallas_call(
        _square_linear_kernel,
        out_shape=jax.ShapeDtypeStruct((M, N), out_dtype),
        grid_spec=pltpu.PrefetchScalarGridSpec(
            num_scalar_prefetch=0,
            grid=grid,
            in_specs=[
                pl.BlockSpec((tm, tk), lambda i, j, k: (i, k)),   # x
                pl.BlockSpec((tn, tk), lambda i, j, k: (j, k)),   # weight (D_out, D_in)
                pl.BlockSpec((1, tn), lambda i, j, k: (0, j)),    # bias slice
            ],
            out_specs=pl.BlockSpec((tm, tn), lambda i, j, k: (i, j)),
            scratch_shapes=[pltpu.VMEM((tm, tn), jnp.float32)],
        ),
        compiler_params=pltpu.CompilerParams(
            dimension_semantics=("parallel", "parallel", "arbitrary"),
            vmem_limit_bytes=vmem_limit,
        ),
        cost_estimate=pl.CostEstimate(
            flops=2 * M * N * K + 2 * M * N,
            bytes_accessed=in_bytes * (M * K + N * K) + 4 * N + out_bytes * M * N,
            transcendentals=0,
        ),
    )(xp, wp, bp)

    return out_padded[:B, :D_out]


if __name__ == "__main__":
    key = jax.random.PRNGKey(0)
    kx, kw, kb = jax.random.split(key, 3)

    # Small shapes consistent with the module (batch=8, input_dim=32, output_dim=16).
    # This hits the single-block fast path.
    B, D_in, D_out = 8, 32, 16
    x = jax.random.normal(kx, (B, D_in), dtype=jnp.float32)
    bound = 1.0 / jnp.sqrt(jnp.float32(D_in))
    weight = jax.random.uniform(kw, (D_out, D_in), jnp.float32, -bound, bound)
    bias = jax.random.uniform(kb, (D_out,), jnp.float32, -bound, bound)

    out = square_layer(x, weight, bias)
    jax.block_until_ready(out)

    # Reference with the same bf16 input rounding (accumulation stays f32).
    ref = jnp.square(
        x.astype(jnp.bfloat16).astype(jnp.float32)
        @ weight.astype(jnp.bfloat16).astype(jnp.float32).T
        + bias
    )
    assert out.shape == (B, D_out)
    assert jnp.allclose(out, ref, atol=1e-2, rtol=1e-2)

    # Ragged, larger shapes with small tile caps to exercise the tiled grid path.
    B2, D_in2, D_out2 = 192, 384, 320
    kx2, kw2, kb2 = jax.random.split(jax.random.PRNGKey(1), 3)
    x2 = jax.random.normal(kx2, (B2, D_in2), dtype=jnp.float32)
    bound2 = 1.0 / jnp.sqrt(jnp.float32(D_in2))
    w2 = jax.random.uniform(kw2, (D_out2, D_in2), jnp.float32, -bound2, bound2)
    b2 = jax.random.uniform(kb2, (D_out2,), jnp.float32, -bound2, bound2)

    out2 = square_layer(x2, w2, b2, tm=64, tn=128, tk=128, fast_path_max_bytes=0)
    jax.block_until_ready(out2)

    ref2 = jnp.square(
        x2.astype(jnp.bfloat16).astype(jnp.float32)
        @ w2.astype(jnp.bfloat16).astype(jnp.float32).T
        + b2
    )
    assert out2.shape == (B2, D_out2)
    assert jnp.allclose(out2, ref2, atol=1e-2, rtol=1e-2)

    print("KERNEL_OK")
</pallas_src>

<mosaic_0001>
module attributes {stable_mosaic.version = 11 : i64} {
  func.func @_square_linear_small_kernel(%arg0: memref<16x128xbf16, #tpu.memory_space<vmem>>, %arg1: memref<128x128xbf16, #tpu.memory_space<vmem>>, %arg2: memref<1x128xf32, #tpu.memory_space<vmem>>, %arg3: memref<16x128xf32, #tpu.memory_space<vmem>>) attributes {dimension_semantics = [], scalar_prefetch = 0 : i64, scratch_operands = 0 : i64, tpu.core_type = #tpu.core_type<tc>} {
    %c0 = arith.constant 0 : index
    %c0_0 = arith.constant 0 : index
    %0 = vector.load %arg0[%c0, %c0_0] : memref<16x128xbf16, #tpu.memory_space<vmem>>, vector<16x128xbf16>
    %c0_1 = arith.constant 0 : index
    %c0_2 = arith.constant 0 : index
    %1 = vector.load %arg1[%c0_1, %c0_2] : memref<128x128xbf16, #tpu.memory_space<vmem>>, vector<128x128xbf16>
    %cst = arith.constant dense<0.000000e+00> : vector<16x128xf32>
    %2 = tpu.matmul %0, %1, %cst {dimension_numbers = #tpu.dot_dimension_numbers<[1], [1], [0], [0], [0, 0, 1, 0], [], []>} : vector<16x128xbf16>, vector<128x128xbf16>, vector<16x128xf32> -> vector<16x128xf32>
    %c0_3 = arith.constant 0 : index
    %c0_4 = arith.constant 0 : index
    %3 = vector.load %arg2[%c0_3, %c0_4] : memref<1x128xf32, #tpu.memory_space<vmem>>, vector<1x128xf32>
    %4 = vector.broadcast %3 : vector<1x128xf32> to vector<16x128xf32>
    %5 = arith.addf %2, %4 : vector<16x128xf32>
    %6 = arith.mulf %5, %5 : vector<16x128xf32>
    %c0_5 = arith.constant 0 : index
    %c0_6 = arith.constant 0 : index
    %7 = vector.load %arg3[%c0_5, %c0_6] : memref<16x128xf32, #tpu.memory_space<vmem>>, vector<16x128xf32>
    tpu.vector_store %arg3[%c0_5, %c0_6], %6 {strides = array<i32>} : memref<16x128xf32, #tpu.memory_space<vmem>>, vector<16x128xf32>,
    return
  }
}

</mosaic_0001>

<bundles_post_ra>
// kernel: square_layer.1
= control target key start
LH: loop header
LB: loop body
LE: loop exit
PB: predicated region body
PF: predicated region fallthrough
CT: control target
= control target key end

     0   :  { %v193_v0 = vmov 0.0   ;;  %vm194_vm0 = vmmov 0   ;;  %s251_s1 = inlined_call_operand.vmem [shape: bf16[128,128], index: 1, kind: input, shape index: {}]   ;;  %s252_s0 = inlined_call_operand.vmem [shape: bf16[16,128], index: 0, kind: input, shape index: {}]   ;;  %s253_s2 = inlined_call_operand.vmem [shape: f32[1,128], index: 2, kind: input, shape index: {}]   ;;  %s254_s3 = inlined_call_operand.vmem [shape: f32[16,128], index: 3, kind: output, shape index: {}]  }
   0x1   :  { %162 = vmatprep.subr.bf16.mxu0 %v193_v0  ;;  %v184_v1 = vld [vmem:[%s251_s1 + $0x38] sm:$0xff]   ;;  %178 = vmatprep.mubr.msk.bf16.mxu0 %vm194_vm0, %v193_v0  ;;  %v185_v2 = vld [vmem:[%s251_s1 + $0x30] sm:$0xff]   ;;  %v186_v3 = vld [vmem:[%s251_s1 + $0x28] sm:$0xff]  }
   0x2   :  { %163 = vmatpush3.bf16.xpose.msra.mxu0 %v184_v1  ;;  %v187_v4 = vld [vmem:[%s251_s1 + $0x20] sm:$0xff]   ;;  %v188_v5 = vld [vmem:[%s251_s1 + $0x18] sm:$0xff]   ;;  %v189_v6 = vld [vmem:[%s251_s1 + $0x10] sm:$0xff]  }
   0x3   :  { %164 = vmatprep.subr.bf16.mxu0 %v193_v0  ;;  %v190_v7 = vld [vmem:[%s251_s1 + $0x8] sm:$0xff]   ;;  %v191_v8 = vld [vmem:[%s251_s1] sm:$0xff]  }
   0x4   :  { %v192_v9 = vld [vmem:[%s252_s0] sm:$0xff]  }
   0x5   :  { %v143_v10 = vld [vmem:[%s253_s2] ss:$0 sm:$0xff] }
   0xa   :  { %165 = vmatpush3.bf16.xpose.msra.mxu0 %v185_v2 }
   0xb   :  { %166 = vmatprep.subr.bf16.mxu0 %v193_v0 }
  0x12   :  { %167 = vmatpush3.bf16.xpose.msra.mxu0 %v186_v3 }
  0x13   :  { %168 = vmatprep.subr.bf16.mxu0 %v193_v0 }
  0x1a   :  { %169 = vmatpush3.bf16.xpose.msra.mxu0 %v187_v4 }
  0x1b   :  { %170 = vmatprep.subr.bf16.mxu0 %v193_v0 }
  0x22   :  { %171 = vmatpush3.bf16.xpose.msra.mxu0 %v188_v5 }
  0x23   :  { %172 = vmatprep.subr.bf16.mxu0 %v193_v0 }
  0x2a   :  { %173 = vmatpush3.bf16.xpose.msra.mxu0 %v189_v6 }
  0x2b   :  { %174 = vmatprep.subr.bf16.mxu0 %v193_v0 }
  0x32   :  { %175 = vmatpush3.bf16.xpose.msra.mxu0 %v190_v7 }
  0x33   :  { %176 = vmatprep.subr.bf16.mxu0 %v193_v0 }
  0x3a   :  { %177 = vmatpush3.bf16.xpose.msra.mxu0 %v191_v8 }
  0x41   :  { %179 = vmatmul.mubr.bf16.vlgmr.msra.gmra.mxu0 %v192_v9 }
 0x101   :  { %v128_v11 = vpop.f32.mrf.mxu0 }
 0x102   :  { %v129_v12 = vadd.f32 %v143_v10, %v128_v11 }
 0x103   :  { %v180_v13 = vpop.f32.mrf.mxu0 }
 0x104   :  { %v135_v14 = vmul.f32 %v129_v12, %v129_v12 }
 0x105   :  { %v131_v15 = vpop.f32.mrf.mxu0 }
 0x106   :  { %137 = vst [vmem:[%s254_s3] sm:$0xff] %v135_v14  ;;  %v132_v16 = vadd.f32 %v143_v10, %v131_v15 }
 0x107   :  { %v181_v17 = vpop.f32.mrf.mxu0 }
 0x108   :  { %v136_v18 = vmul.f32 %v132_v16, %v132_v16 }
 0x10a   :  { %138 = vst [vmem:[%s254_s3 + $0x8] sm:$0xff] %v136_v18 }

</bundles_post_ra>
